<compile_context>
chip_gen: v6e
topology: v6e:2x2x1
jax: 0.10.0
libtpu: 0.0.40
codegen_flags: <defaults>
</compile_context>

<pallas_src>
import functools

import jax
import jax.numpy as jnp
from jax.experimental import pallas as pl
from jax.experimental.pallas import tpu as pltpu


def _round_up(x: int, m: int) -> int:
    return ((x + m - 1) // m) * m


def _mlp_kernel(x_ref, *refs, num_layers: int, matmul_dtype):
    """refs = (w0, b0, w1, b1, ..., w_{L-1}, b_{L-1}, o_ref).

    x_ref: (TM, in_dim), native dtype.
    w_i:   (in_i_pad, out_i_pad), matmul_dtype (pre-transposed in the wrapper).
    b_i:   (1, out_i_pad), f32.
    o_ref: (TM, out_pad).
    """
    o_ref = refs[-1]
    wb = refs[:-1]

    y = x_ref[...]
    for i in range(num_layers):
        w = wb[2 * i][...]        # (in_pad, out_pad), matmul_dtype
        b = wb[2 * i + 1][...]    # (1, out_pad), f32
        # bf16 operands, f32 accumulation, standard (M,K)x(K,N) MXU feed.
        y = jnp.dot(y.astype(matmul_dtype), w, preferred_element_type=jnp.float32)
        y = y + b                 # f32 elementwise
        if i < num_layers - 1:
            y = jnp.maximum(y, 0.0)
    o_ref[...] = y.astype(o_ref.dtype)


def mlp_forward(x, params, *, matmul_dtype=jnp.bfloat16, max_tm: int = 1024):
    """Fused MLP forward. x: (..., in_dim); params: [(W(out,in), b(out,)), ...]."""
    orig_shape = x.shape
    in_dim = orig_shape[-1]
    num_layers = len(params)
    out_dim = params[-1][0].shape[0]
    out_dtype = x.dtype

    # Flatten leading dims to a row axis; keep the input's native dtype.
    x2 = x.reshape(-1, in_dim)
    rows = x2.shape[0]

    # --- Weight prep: transpose to (in, out), pad every output width to a
    # multiple of 128 (lane-dense), cast matmul operands to bf16 once.
    prepped = []
    prev_pad = in_dim
    for (w, b) in params:
        out_i, in_i = w.shape
        out_i_pad = _round_up(out_i, 128)
        wt = jnp.asarray(w, jnp.float32).T                       # (in_i, out_i)
        wt = jnp.pad(wt, ((0, prev_pad - in_i), (0, out_i_pad - out_i)))
        bp = jnp.pad(jnp.asarray(b, jnp.float32), (0, out_i_pad - out_i))
        prepped.append((wt.astype(matmul_dtype), bp.reshape(1, -1)))
        prev_pad = out_i_pad
    out_pad = prev_pad

    # --- VMEM budget: derived from the chip's actual VMEM (v7x 64 MiB/core,
    # v5e/v6e 128 MiB), weights counted once (single-buffered), plus the
    # chained f32 intermediates between layers.
    vmem_cap = 64 * 1024 * 1024
    try:
        info = pltpu.get_tpu_info()
        vmem_cap = int(getattr(info, "vmem_capacity_bytes", vmem_cap))
    except Exception:
        pass
    budget = vmem_cap // 2
    vmem_limit = int(min(vmem_cap * 0.9, 100 * 1024 * 1024))

    x_itemsize = jnp.dtype(x2.dtype).itemsize
    out_itemsize = jnp.dtype(out_dtype).itemsize
    mm_itemsize = jnp.dtype(matmul_dtype).itemsize
    weight_bytes = sum(int(w.size) * w.dtype.itemsize + int(b.size) * b.dtype.itemsize
                       for (w, b) in prepped)
    max_width = max([in_dim] + [int(w.shape[1]) for (w, _) in prepped])
    per_row_bytes = (2 * in_dim * x_itemsize          # double-buffered input tile
                     + 2 * out_pad * out_itemsize     # double-buffered output tile
                     + 3 * max_width * 4              # chained f32 intermediates
                     + max_width * mm_itemsize)       # bf16 cast scratch
    tm_fit = max(8, ((budget - weight_bytes) // max(per_row_bytes, 1)) // 8 * 8)

    rows_pad = _round_up(max(rows, 8), 8)
    tm = max(8, min(max_tm, rows_pad, tm_fit))
    tm = _round_up(tm, 8)

    # Make tm divide rows_pad (no partial/masked final block) and guarantee
    # >=2 grid steps when rows allow (v7x second TensorCore utilization).
    g = pl.cdiv(rows_pad, tm)
    if g == 1 and rows_pad >= 16:
        g = 2
    tm = _round_up(pl.cdiv(rows_pad, g), 8)
    rows_pad = g * tm
    if rows_pad != rows:
        x2 = jnp.pad(x2, ((0, rows_pad - rows), (0, 0)))

    grid = (rows_pad // tm,)

    flat_args = [x2]
    for (w, b) in prepped:
        flat_args.extend((w, b))

    def run(buffered_weights: bool):
        def resident(shape):
            if buffered_weights:
                return pl.BlockSpec(shape, lambda i: (0, 0),
                                    pipeline_mode=pl.Buffered(1))
            return pl.BlockSpec(shape, lambda i: (0, 0))

        in_specs = [pl.BlockSpec((tm, in_dim), lambda i: (i, 0))]
        for (w, b) in prepped:
            in_specs.append(resident(w.shape))   # resident weight
            in_specs.append(resident(b.shape))   # resident bias
        out_specs = pl.BlockSpec((tm, out_pad), lambda i: (i, 0))

        return pl.pallas_call(
            functools.partial(_mlp_kernel, num_layers=num_layers,
                              matmul_dtype=matmul_dtype),
            out_shape=jax.ShapeDtypeStruct((rows_pad, out_pad), out_dtype),
            grid=grid,
            in_specs=in_specs,
            out_specs=out_specs,
            compiler_params=pltpu.CompilerParams(
                dimension_semantics=("parallel",),
                vmem_limit_bytes=vmem_limit,
            ),
        )(*flat_args)

    use_buffered = hasattr(pl, "Buffered")
    try:
        y = run(use_buffered)
    except Exception:
        if not use_buffered:
            raise
        y = run(False)   # fallback: default (double-buffered) resident weights

    y = y[:rows, :out_dim]
    return y.reshape(orig_shape[:-1] + (out_dim,))


def init_mlp_params(key, in_dim, hidden_dim, out_dim, num_layers):
    """Deterministic init matching nn.Linear shapes (W: (out, in), b: (out,))."""
    h = [hidden_dim] * (num_layers - 1)
    dims = list(zip([in_dim] + h, h + [out_dim]))
    params = []
    for n, k in dims:
        key, kw, kb = jax.random.split(key, 3)
        bound = 1.0 / jnp.sqrt(jnp.float32(n))
        w = jax.random.uniform(kw, (k, n), jnp.float32, -bound, bound)
        b = jax.random.uniform(kb, (k,), jnp.float32, -bound, bound)
        params.append((w, b))
    return params


def mlp_forward_ref(x, params, matmul_dtype=jnp.float32):
    num_layers = len(params)
    y = x.astype(jnp.float32)
    for i, (w, b) in enumerate(params):
        y = jnp.dot(y.astype(matmul_dtype), w.T.astype(matmul_dtype),
                    preferred_element_type=jnp.float32) + b.astype(jnp.float32)
        if i < num_layers - 1:
            y = jnp.maximum(y, 0.0)
    return y.astype(x.dtype)


if __name__ == "__main__":
    key = jax.random.PRNGKey(0)
    kx, kp = jax.random.split(key)

    # Small DETR-like shapes: batch=2, num_queries=8, in_dim=32, hidden=32, out=8
    batch, seq, in_dim, hidden_dim, out_dim, num_layers = 2, 8, 32, 32, 8, 3
    x = jax.random.normal(kx, (batch, seq, in_dim), jnp.float32)

    params = init_mlp_params(kp, in_dim, hidden_dim, out_dim, num_layers)

    out = mlp_forward(x, params)
    out = jax.block_until_ready(out)

    ref_bf16 = mlp_forward_ref(x, params, matmul_dtype=jnp.bfloat16)
    ref_f32 = mlp_forward_ref(x, params, matmul_dtype=jnp.float32)

    assert out.shape == (batch, seq, out_dim)
    assert jnp.allclose(out, ref_bf16, atol=2e-3, rtol=2e-3)   # matches bf16-MXU math
    assert jnp.allclose(out, ref_f32, atol=5e-2, rtol=5e-2)    # sane vs f32 math

    print("KERNEL_OK")
</pallas_src>

<mosaic_0001>
module attributes {stable_mosaic.version = 11 : i64} {
  func.func @_mlp_kernel(%arg0: i32, %arg1: memref<8x32xf32, #tpu.memory_space<vmem>>, %arg2: memref<32x128xbf16, #tpu.memory_space<vmem>>, %arg3: memref<1x128xf32, #tpu.memory_space<vmem>>, %arg4: memref<128x128xbf16, #tpu.memory_space<vmem>>, %arg5: memref<1x128xf32, #tpu.memory_space<vmem>>, %arg6: memref<128x128xbf16, #tpu.memory_space<vmem>>, %arg7: memref<1x128xf32, #tpu.memory_space<vmem>>, %arg8: memref<8x128xf32, #tpu.memory_space<vmem>>) attributes {dimension_semantics = [#tpu.dimension_semantics<parallel>], iteration_bounds = array<i64: 2>, scalar_prefetch = 0 : i64, scratch_operands = 0 : i64, tpu.core_type = #tpu.core_type<tc>, window_params = [{transform_indices = @transform_0, window_bounds = array<i64: 8, 32>}, {pipeline_mode = #tpu.pipeline_mode<synchronous>, transform_indices = @transform_1, window_bounds = array<i64: 32, 128>}, {pipeline_mode = #tpu.pipeline_mode<synchronous>, transform_indices = @transform_2, window_bounds = array<i64: 1, 128>}, {pipeline_mode = #tpu.pipeline_mode<synchronous>, transform_indices = @transform_3, window_bounds = array<i64: 128, 128>}, {pipeline_mode = #tpu.pipeline_mode<synchronous>, transform_indices = @transform_4, window_bounds = array<i64: 1, 128>}, {pipeline_mode = #tpu.pipeline_mode<synchronous>, transform_indices = @transform_5, window_bounds = array<i64: 128, 128>}, {pipeline_mode = #tpu.pipeline_mode<synchronous>, transform_indices = @transform_6, window_bounds = array<i64: 1, 128>}, {transform_indices = @transform_7, window_bounds = array<i64: 8, 128>}]} {
    %c0 = arith.constant 0 : index
    %c0_0 = arith.constant 0 : index
    %0 = vector.load %arg1[%c0, %c0_0] : memref<8x32xf32, #tpu.memory_space<vmem>>, vector<8x32xf32>
    %c0_1 = arith.constant 0 : index
    %c0_2 = arith.constant 0 : index
    %1 = vector.load %arg2[%c0_1, %c0_2] : memref<32x128xbf16, #tpu.memory_space<vmem>>, vector<32x128xbf16>
    %c0_3 = arith.constant 0 : index
    %c0_4 = arith.constant 0 : index
    %2 = vector.load %arg3[%c0_3, %c0_4] : memref<1x128xf32, #tpu.memory_space<vmem>>, vector<1x128xf32>
    %3 = arith.truncf %0 : vector<8x32xf32> to vector<8x32xbf16>
    %cst = arith.constant dense<0.000000e+00> : vector<8x128xf32>
    %4 = tpu.matmul %3, %1, %cst {dimension_numbers = #tpu.dot_dimension_numbers<[1], [0], [0], [1], [0, 0, 1, 1], [], []>} : vector<8x32xbf16>, vector<32x128xbf16>, vector<8x128xf32> -> vector<8x128xf32>
    %5 = vector.broadcast %2 : vector<1x128xf32> to vector<8x128xf32>
    %6 = arith.addf %4, %5 : vector<8x128xf32>
    %cst_5 = arith.constant 0.000000e+00 : f32
    %7 = vector.broadcast %cst_5 : f32 to vector<8x128xf32>
    %8 = arith.maximumf %6, %7 : vector<8x128xf32>
    %c0_6 = arith.constant 0 : index
    %c0_7 = arith.constant 0 : index
    %9 = vector.load %arg4[%c0_6, %c0_7] : memref<128x128xbf16, #tpu.memory_space<vmem>>, vector<128x128xbf16>
    %c0_8 = arith.constant 0 : index
    %c0_9 = arith.constant 0 : index
    %10 = vector.load %arg5[%c0_8, %c0_9] : memref<1x128xf32, #tpu.memory_space<vmem>>, vector<1x128xf32>
    %11 = arith.truncf %8 : vector<8x128xf32> to vector<8x128xbf16>
    %cst_10 = arith.constant dense<0.000000e+00> : vector<8x128xf32>
    %12 = tpu.matmul %11, %9, %cst_10 {dimension_numbers = #tpu.dot_dimension_numbers<[1], [0], [0], [1], [0, 0, 1, 1], [], []>} : vector<8x128xbf16>, vector<128x128xbf16>, vector<8x128xf32> -> vector<8x128xf32>
    %13 = vector.broadcast %10 : vector<1x128xf32> to vector<8x128xf32>
    %14 = arith.addf %12, %13 : vector<8x128xf32>
    %cst_11 = arith.constant 0.000000e+00 : f32
    %15 = vector.broadcast %cst_11 : f32 to vector<8x128xf32>
    %16 = arith.maximumf %14, %15 : vector<8x128xf32>
    %c0_12 = arith.constant 0 : index
    %c0_13 = arith.constant 0 : index
    %17 = vector.load %arg6[%c0_12, %c0_13] : memref<128x128xbf16, #tpu.memory_space<vmem>>, vector<128x128xbf16>
    %c0_14 = arith.constant 0 : index
    %c0_15 = arith.constant 0 : index
    %18 = vector.load %arg7[%c0_14, %c0_15] : memref<1x128xf32, #tpu.memory_space<vmem>>, vector<1x128xf32>
    %19 = arith.truncf %16 : vector<8x128xf32> to vector<8x128xbf16>
    %cst_16 = arith.constant dense<0.000000e+00> : vector<8x128xf32>
    %20 = tpu.matmul %19, %17, %cst_16 {dimension_numbers = #tpu.dot_dimension_numbers<[1], [0], [0], [1], [0, 0, 1, 1], [], []>} : vector<8x128xbf16>, vector<128x128xbf16>, vector<8x128xf32> -> vector<8x128xf32>
    %21 = vector.broadcast %18 : vector<1x128xf32> to vector<8x128xf32>
    %22 = arith.addf %20, %21 : vector<8x128xf32>
    %c0_17 = arith.constant 0 : index
    %c0_18 = arith.constant 0 : index
    %23 = vector.load %arg8[%c0_17, %c0_18] : memref<8x128xf32, #tpu.memory_space<vmem>>, vector<8x128xf32>
    tpu.vector_store %arg8[%c0_17, %c0_18], %22 {strides = array<i32>} : memref<8x128xf32, #tpu.memory_space<vmem>>, vector<8x128xf32>,
    return
  }
  func.func @transform_0(%arg0: i32) -> (i32, i32) {
    %c0_i32 = arith.constant 0 : i32
    %c0_i32_0 = arith.constant 0 : i32
    return %arg0, %c0_i32 : i32, i32
  }
  func.func @transform_1(%arg0: i32) -> (i32, i32) {
    %c0_i32 = arith.constant 0 : i32
    %c0_i32_0 = arith.constant 0 : i32
    %c0_i32_1 = arith.constant 0 : i32
    return %c0_i32, %c0_i32_0 : i32, i32
  }
  func.func @transform_2(%arg0: i32) -> (i32, i32) {
    %c0_i32 = arith.constant 0 : i32
    %c0_i32_0 = arith.constant 0 : i32
    %c0_i32_1 = arith.constant 0 : i32
    return %c0_i32, %c0_i32_0 : i32, i32
  }
  func.func @transform_3(%arg0: i32) -> (i32, i32) {
    %c0_i32 = arith.constant 0 : i32
    %c0_i32_0 = arith.constant 0 : i32
    %c0_i32_1 = arith.constant 0 : i32
    return %c0_i32, %c0_i32_0 : i32, i32
  }
  func.func @transform_4(%arg0: i32) -> (i32, i32) {
    %c0_i32 = arith.constant 0 : i32
    %c0_i32_0 = arith.constant 0 : i32
    %c0_i32_1 = arith.constant 0 : i32
    return %c0_i32, %c0_i32_0 : i32, i32
  }
  func.func @transform_5(%arg0: i32) -> (i32, i32) {
    %c0_i32 = arith.constant 0 : i32
    %c0_i32_0 = arith.constant 0 : i32
    %c0_i32_1 = arith.constant 0 : i32
    return %c0_i32, %c0_i32_0 : i32, i32
  }
  func.func @transform_6(%arg0: i32) -> (i32, i32) {
    %c0_i32 = arith.constant 0 : i32
    %c0_i32_0 = arith.constant 0 : i32
    %c0_i32_1 = arith.constant 0 : i32
    return %c0_i32, %c0_i32_0 : i32, i32
  }
  func.func @transform_7(%arg0: i32) -> (i32, i32) {
    %c0_i32 = arith.constant 0 : i32
    %c0_i32_0 = arith.constant 0 : i32
    return %arg0, %c0_i32 : i32, i32
  }
}

module attributes {stable_mosaic.version = 11 : i64} {
  func.func @_mlp_kernel(%arg0: i32, %arg1: memref<8x32xf32, #tpu.memory_space<vmem>>, %arg2: memref<32x128xbf16, #tpu.memory_space<vmem>>, %arg3: memref<1x128xf32, #tpu.memory_space<vmem>>, %arg4: memref<128x128xbf16, #tpu.memory_space<vmem>>, %arg5: memref<1x128xf32, #tpu.memory_space<vmem>>, %arg6: memref<128x128xbf16, #tpu.memory_space<vmem>>, %arg7: memref<1x128xf32, #tpu.memory_space<vmem>>, %arg8: memref<8x128xf32, #tpu.memory_space<vmem>>) attributes {dimension_semantics = [#tpu.dimension_semantics<parallel>], iteration_bounds = array<i64: 2>, scalar_prefetch = 0 : i64, scratch_operands = 0 : i64, tpu.core_type = #tpu.core_type<tc>, window_params = [{transform_indices = @transform_0, window_bounds = array<i64: 8, 32>}, {pipeline_mode = #tpu.pipeline_mode<synchronous>, transform_indices = @transform_1, window_bounds = array<i64: 32, 128>}, {pipeline_mode = #tpu.pipeline_mode<synchronous>, transform_indices = @transform_2, window_bounds = array<i64: 1, 128>}, {pipeline_mode = #tpu.pipeline_mode<synchronous>, transform_indices = @transform_3, window_bounds = array<i64: 128, 128>}, {pipeline_mode = #tpu.pipeline_mode<synchronous>, transform_indices = @transform_4, window_bounds = array<i64: 1, 128>}, {pipeline_mode = #tpu.pipeline_mode<synchronous>, transform_indices = @transform_5, window_bounds = array<i64: 128, 128>}, {pipeline_mode = #tpu.pipeline_mode<synchronous>, transform_indices = @transform_6, window_bounds = array<i64: 1, 128>}, {transform_indices = @transform_7, window_bounds = array<i64: 8, 128>}]} {
    %c0 = arith.constant 0 : index
    %c0_0 = arith.constant 0 : index
    %0 = vector.load %arg1[%c0, %c0_0] : memref<8x32xf32, #tpu.memory_space<vmem>>, vector<8x32xf32>
    %c0_1 = arith.constant 0 : index
    %c0_2 = arith.constant 0 : index
    %1 = vector.load %arg2[%c0_1, %c0_2] : memref<32x128xbf16, #tpu.memory_space<vmem>>, vector<32x128xbf16>
    %c0_3 = arith.constant 0 : index
    %c0_4 = arith.constant 0 : index
    %2 = vector.load %arg3[%c0_3, %c0_4] : memref<1x128xf32, #tpu.memory_space<vmem>>, vector<1x128xf32>
    %3 = arith.truncf %0 : vector<8x32xf32> to vector<8x32xbf16>
    %cst = arith.constant dense<0.000000e+00> : vector<8x128xf32>
    %4 = tpu.matmul %3, %1, %cst {dimension_numbers = #tpu.dot_dimension_numbers<[1], [0], [0], [1], [0, 0, 1, 1], [], []>} : vector<8x32xbf16>, vector<32x128xbf16>, vector<8x128xf32> -> vector<8x128xf32>
    %5 = vector.broadcast %2 : vector<1x128xf32> to vector<8x128xf32>
    %6 = arith.addf %4, %5 : vector<8x128xf32>
    %cst_5 = arith.constant 0.000000e+00 : f32
    %7 = vector.broadcast %cst_5 : f32 to vector<8x128xf32>
    %8 = arith.maximumf %6, %7 : vector<8x128xf32>
    %c0_6 = arith.constant 0 : index
    %c0_7 = arith.constant 0 : index
    %9 = vector.load %arg4[%c0_6, %c0_7] : memref<128x128xbf16, #tpu.memory_space<vmem>>, vector<128x128xbf16>
    %c0_8 = arith.constant 0 : index
    %c0_9 = arith.constant 0 : index
    %10 = vector.load %arg5[%c0_8, %c0_9] : memref<1x128xf32, #tpu.memory_space<vmem>>, vector<1x128xf32>
    %11 = arith.truncf %8 : vector<8x128xf32> to vector<8x128xbf16>
    %cst_10 = arith.constant dense<0.000000e+00> : vector<8x128xf32>
    %12 = tpu.matmul %11, %9, %cst_10 {dimension_numbers = #tpu.dot_dimension_numbers<[1], [0], [0], [1], [0, 0, 1, 1], [], []>} : vector<8x128xbf16>, vector<128x128xbf16>, vector<8x128xf32> -> vector<8x128xf32>
    %13 = vector.broadcast %10 : vector<1x128xf32> to vector<8x128xf32>
    %14 = arith.addf %12, %13 : vector<8x128xf32>
    %cst_11 = arith.constant 0.000000e+00 : f32
    %15 = vector.broadcast %cst_11 : f32 to vector<8x128xf32>
    %16 = arith.maximumf %14, %15 : vector<8x128xf32>
    %c0_12 = arith.constant 0 : index
    %c0_13 = arith.constant 0 : index
    %17 = vector.load %arg6[%c0_12, %c0_13] : memref<128x128xbf16, #tpu.memory_space<vmem>>, vector<128x128xbf16>
    %c0_14 = arith.constant 0 : index
    %c0_15 = arith.constant 0 : index
    %18 = vector.load %arg7[%c0_14, %c0_15] : memref<1x128xf32, #tpu.memory_space<vmem>>, vector<1x128xf32>
    %19 = arith.truncf %16 : vector<8x128xf32> to vector<8x128xbf16>
    %cst_16 = arith.constant dense<0.000000e+00> : vector<8x128xf32>
    %20 = tpu.matmul %19, %17, %cst_16 {dimension_numbers = #tpu.dot_dimension_numbers<[1], [0], [0], [1], [0, 0, 1, 1], [], []>} : vector<8x128xbf16>, vector<128x128xbf16>, vector<8x128xf32> -> vector<8x128xf32>
    %21 = vector.broadcast %18 : vector<1x128xf32> to vector<8x128xf32>
    %22 = arith.addf %20, %21 : vector<8x128xf32>
    %c0_17 = arith.constant 0 : index
    %c0_18 = arith.constant 0 : index
    %23 = vector.load %arg8[%c0_17, %c0_18] : memref<8x128xf32, #tpu.memory_space<vmem>>, vector<8x128xf32>
    tpu.vector_store %arg8[%c0_17, %c0_18], %22 {strides = array<i32>} : memref<8x128xf32, #tpu.memory_space<vmem>>, vector<8x128xf32>,
    return
  }
  func.func @transform_0(%arg0: i32) -> (i32, i32) {
    %c0_i32 = arith.constant 0 : i32
    %c0_i32_0 = arith.constant 0 : i32
    return %arg0, %c0_i32 : i32, i32
  }
  func.func @transform_1(%arg0: i32) -> (i32, i32) {
    %c0_i32 = arith.constant 0 : i32
    %c0_i32_0 = arith.constant 0 : i32
    %c0_i32_1 = arith.constant 0 : i32
    return %c0_i32, %c0_i32_0 : i32, i32
  }
  func.func @transform_2(%arg0: i32) -> (i32, i32) {
    %c0_i32 = arith.constant 0 : i32
    %c0_i32_0 = arith.constant 0 : i32
    %c0_i32_1 = arith.constant 0 : i32
    return %c0_i32, %c0_i32_0 : i32, i32
  }
  func.func @transform_3(%arg0: i32) -> (i32, i32) {
    %c0_i32 = arith.constant 0 : i32
    %c0_i32_0 = arith.constant 0 : i32
    %c0_i32_1 = arith.constant 0 : i32
    return %c0_i32, %c0_i32_0 : i32, i32
  }
  func.func @transform_4(%arg0: i32) -> (i32, i32) {
    %c0_i32 = arith.constant 0 : i32
    %c0_i32_0 = arith.constant 0 : i32
    %c0_i32_1 = arith.constant 0 : i32
    return %c0_i32, %c0_i32_0 : i32, i32
  }
  func.func @transform_5(%arg0: i32) -> (i32, i32) {
    %c0_i32 = arith.constant 0 : i32
    %c0_i32_0 = arith.constant 0 : i32
    %c0_i32_1 = arith.constant 0 : i32
    return %c0_i32, %c0_i32_0 : i32, i32
  }
  func.func @transform_6(%arg0: i32) -> (i32, i32) {
    %c0_i32 = arith.constant 0 : i32
    %c0_i32_0 = arith.constant 0 : i32
    %c0_i32_1 = arith.constant 0 : i32
    return %c0_i32, %c0_i32_0 : i32, i32
  }
  func.func @transform_7(%arg0: i32) -> (i32, i32) {
    %c0_i32 = arith.constant 0 : i32
    %c0_i32_0 = arith.constant 0 : i32
    return %arg0, %c0_i32 : i32, i32
  }
}

</mosaic_0001>

<bundles_post_ra>
// kernel: tpu_custom_call.1
= control target key start
LH: loop header
LB: loop body
LE: loop exit
PB: predicated region body
PF: predicated region fallthrough
CT: control target
= control target key end

     0   :  { %s1411_s0 = inlined_call_operand.hbm [shape: f32[16,32], index: 0, kind: input, shape index: {}]   ;;  %s1412_s1 = inlined_call_operand.hbm [shape: bf16[32,128], index: 1, kind: input, shape index: {}]   ;;  %s1413_s2 = inlined_call_operand.vmem [shape: f32[1,128], index: 2, kind: input, shape index: {}]   ;;  %s1414_s3 = inlined_call_operand.hbm [shape: bf16[128,128], index: 3, kind: input, shape index: {}]   ;;  %s1415_s4 = inlined_call_operand.vmem [shape: f32[1,128], index: 4, kind: input, shape index: {}]   ;;  %s1416_s5 = inlined_call_operand.hbm [shape: bf16[128,128], index: 5, kind: input, shape index: {}]   ;;  %s1417_s6 = inlined_call_operand.vmem [shape: f32[1,128], index: 6, kind: input, shape index: {}]   ;;  %s1418_s7 = inlined_call_operand.hbm [shape: f32[16,128], index: 7, kind: output, shape index: {}]  }
   0x1   :  { %1423 = sst [smem:[#allocation15_spill]] %s1412_s1 }
   0x2   :  { %1424 = sst [smem:[#allocation16_spill]] %s1414_s3 }
   0x3   :  { %12 = vsyncpa [#allocation3], 0 }
   0x4   :  { %14 = vsyncpa [#allocation3 + $0x1], 0 }
   0x5   :  { %15 = vsyncpa [#allocation6], 0 }
   0x6   :  { %16 = vsyncpa [#allocation9], 0 }
   0x7   :  { %17 = vsyncpa [#allocation4], 0 }
   0x8   :  { %19 = vsyncpa [#allocation4 + $0x1], 0  ;;  %s1185_s24 = smov 0   ;;  %s1187_s25 = smov 0  }
   0x9   :  { %s1189_s26 = smov 0   ;;  %s1191_s27 = smov 0  }
   0xa LB: > { %s1206_s28 = sadd.s32 4294967295, %s1134_s27   ;;  %s748_s29 = sadd.s32 4294967294, %s1134_s27   ;;  %s1134_s27 = sphi %s1191_s27, %s1446_s27   ;;  %s1130_s26 = sphi %s1189_s26, %s1445_s26   ;;  %s1126_s25 = sphi %s1187_s25, %s1444_s25   ;;  %s1122_s24 = sphi %s1185_s24, %s1443_s24  }
   0xb   : > { %p45_p0 = scmp.ne.s32.totalorder %s1126_s25, %s1122_s24  ;;  %p1419_p1 = scmp.eq.s32.totalorder %s1206_s28, 0 }
   0xc   : > { %p201_p3 = scmp.eq.s32.totalorder %s748_s29, 1  ;;  %p749_p5 = scmp.ge.s32.totalorder %s1134_s27, 1 }
   0xd   : > { %p1215_p4 = por %p1419_p1, %p45_p0  ;;  %p208_p7 = scmp.lt.s32.totalorder %s1134_s27, 3 }
   0xe   : > { %p1220_p6 = por %p201_p3, %p45_p0  ;;  %s1136_s10 = smov [#allocation5]  }
   0xf   : > { %s1425_s30 = scalar_select %p1215_p4, 1, 0 }
  0x10   : > { %s1426_s8 = scalar_select %p1220_p6, 1, 0 }
  0x11   : > { %p1225_p8 = pnand %p749_p5, %p208_p7  ;;  %s220_s11 = sshll.u32 %s1136_s10, 4  ;;  %s221_s11 = int_to_ptr.vmem [resolvable:$true] %s220_s11 }
  0x12   : > { %s1137_s13 = smov [#allocation7]   ;;  %s1138_s15 = smov [#allocation8]  }
  0x13   : > { %s1427_s9 = scalar_select %p1225_p8, 1, 0 }
  0x14   : > { %p873_p9 = pneg %p1225_p8  ;;  %s236_s14 = sshll.u32 %s1137_s13, 4  ;;  %s237_s14 = int_to_ptr.vmem [resolvable:$true] %s236_s14 }
  0x15   : > { %s252_s16 = sshll.u32 %s1138_s15, 4  ;;  %s967_s17 = scalar_lea.vmem %s221_s11, 256  ;;  %s253_s16 = int_to_ptr.vmem [resolvable:$true] %s252_s16 }
  0x16   : > { %p1234_p11 = pnand %p873_p9, %p1419_p1  ;;  %p968_p13 = scmp.ne.s32.totalorder %s221_s11, %s967_s17 }
  0x17   : > { %p975_p5 = scmp.lt.s32.totalorder %s221_s11, %s221_s11  ;;  %p976_p7 = scmp.lt.s32.totalorder %s967_s17, %s967_s17 }
  0x18   : > { %p958_p12 = pneg %p1234_p11 }
  0x19   : > { %p977_p9 = por %p976_p7, %p975_p5 }
  0x1a   : > { %p970_p0 = pnand %p968_p13, %p958_p12 }
  0x1c   : > { %p971_p3 = pneg %p970_p0 }
  0x1e   : > { %p978_p10 = pnand %p977_p9, %p971_p3 }
  0x20   : > { %981 = shalt.err (!%p978_p10)
}
  0x21   : > { %s1139_s18 = smov 64   ;;  %s1140_s19 = smov 4  }
  0x22   : > { %s1429_s1 = sld [smem:[#allocation15_spill]]  ;;  %s993_s22 = scalar_lea.vmem %s237_s14, 1024 }
  0x23   : > { %p994_p1 = scmp.ne.s32.totalorder %s237_s14, %s993_s22  ;;  %p1001_p2 = scmp.lt.s32.totalorder %s237_s14, %s237_s14 }
  0x24   : > { %p1002_p6 = scmp.lt.s32.totalorder %s993_s22, %s993_s22 }
  0x25   : > { %p996_p13 = pnand %p994_p1, %p958_p12 }
  0x26   : > { %p1003_p5 = por %p1002_p6, %p1001_p2 }
  0x27   : > { %p997_p0 = pneg %p996_p13 }
  0x28   : > { %876 = dma.hbm_to_vmem [thread:$0]  (!%p1234_p11), %s1429_s1, 256, %s221_s11, [#allocation6], %s1139_s18, %s1139_s18, %s1140_s19  }
  0x29   : > { %p1004_p3 = pnand %p1003_p5, %p997_p0 }
  0x2b   : > { %1007 = shalt.err (!%p1004_p3)
}
  0x2c   : > { %s1430_s3 = sld [smem:[#allocation16_spill]]  ;;  %s1019_s10 = scalar_lea.vmem %s253_s16, 1024 }
  0x2d   : > { %p1020_p10 = scmp.ne.s32.totalorder %s253_s16, %s1019_s10  ;;  %p1027_p9 = scmp.lt.s32.totalorder %s253_s16, %s253_s16 }
  0x2e   : > { %p1028_p13 = scmp.lt.s32.totalorder %s1019_s10, %s1019_s10 }
  0x2f   : > { %p1022_p7 = pnand %p1020_p10, %p958_p12 }
  0x30   : > { %p1029_p4 = por %p1028_p13, %p1027_p9 }
  0x31   : > { %p1023_p1 = pneg %p1022_p7 }
  0x32   : > { %879 = dma.hbm_to_vmem [thread:$0]  (!%p1234_p11), %s1430_s3, 1024, %s237_s14, [#allocation6], %s1139_s18, %s1139_s18, %s1140_s19  }
  0x33   : > { %p1030_p2 = pnand %p1029_p4, %p1023_p1 }
  0x35   : > { %1033 = shalt.err (!%p1030_p2)
}
  0x36   : > { %882 = dma.hbm_to_vmem [thread:$0]  (!%p1234_p11), %s1416_s5, 1024, %s253_s16, [#allocation9], %s1139_s18, %s1139_s18, %s1140_s19  }
  0x37   : > { %s1265_s14 = sadd.s32 1, %s1134_s27   ;;  %s32_s12 = sadd.s32 1, %s1130_s26 }
  0x38   : > { %s29_s15 = ssub.s32 %s1134_s27, %s1265_s14  ;;  %p39_p6 = scmp.ne.s32.totalorder %s1130_s26, %s1126_s25 }
  0x39   : > { %p30_p4 = scmp.eq.s32.totalorder %s29_s15, 0  ;;  %p40_p12 = scmp.eq.s32.totalorder %s1134_s27, 0 }
  0x3a   : > { %p894_p0 = scmp.lt.s32.totalorder %s1134_s27, 2  ;;  %p1431_p3 = scmp.eq.s32.totalorder %s1206_s28, 1 }
  0x3b   : > { %s1275_s17 = scalar_select %p30_p4, %s1130_s26, %s32_s12  }
  0x3c   : > { %p41_p5 = por %p40_p12, %p39_p6  ;;  %p1279_p10 = por %p1431_p3, %p39_p6 }
  0x3d   : > { %s269_s21 = sand.u32 1, %s1130_s26   ;;  %s755_s22 = sshll.u32 %s1134_s27, 7 }
  0x3e   : > { %s1432_s20 = scalar_select %p1279_p10, 1, 0 }
  0x3f   : > { %s754_s16 = sshll.u32 %s269_s21, 3  ;;  %s1288_s23 = scalar_lea.hbm %s1411_s0, %s755_s22 }
  0x40   : > { %s273_s29 = scalar_lea.vmem [#allocation2], %s754_s16  ;;  %p1290_p11 = pnand %p894_p0, %p41_p5 }
  0x41   : > { %s280_s10 = sshll.u32 %s273_s29, 4  ;;  %s270_s13 = scalar_lea.sflag [#allocation3], %s269_s21  ;;  %s281_s10 = int_to_ptr.vmem [resolvable:$true] %s280_s10 }
  0x42   : > { %s1034_s15 = scalar_lea.hbm %s1288_s23, 128  ;;  %p1036_p1 = pneg %p1290_p11 }
  0x43   : > { %p1035_p7 = scmp.ne.s32.totalorder %s1288_s23, %s1034_s15  ;;  %s1039_s18 = scalar_lea.hbm %s1411_s0, 256 }
  0x44   : > { %p1040_p2 = scmp.lt.s32.totalorder %s1288_s23, %s1411_s0  ;;  %p1041_p4 = scmp.lt.s32.totalorder %s1039_s18, %s1034_s15 }
  0x45   : > { %p1037_p9 = pnand %p1036_p1, %p1035_p7 }
  0x46   : > { %p1042_p6 = por %p1041_p4, %p1040_p2 }
  0x47   : > { %p1038_p13 = pneg %p1037_p9 }
  0x49   : > { %p1043_p12 = pnand %p1042_p6, %p1038_p13 }
  0x4b   : > { %1046 = shalt.err (!%p1043_p12)
}
  0x4c   : > { %s1047_s29 = scalar_lea.vmem %s281_s10, 128  ;;  %s1141_s21 = smov [#allocation2]  }
  0x4d   : > { %p1048_p0 = scmp.ne.s32.totalorder %s281_s10, %s1047_s29  ;;  %s1052_s1 = sshll.u32 %s1141_s21, 4  ;;  %s1053_s1 = int_to_ptr.vmem [resolvable:$false] %s1052_s1 }
  0x4e   : > { %s1054_s3 = scalar_lea.vmem %s1053_s1, 256  ;;  %p1055_p7 = scmp.lt.s32.totalorder %s281_s10, %s1053_s1 }
  0x4f   : > { %p1050_p5 = pnand %p1048_p0, %p1036_p1  ;;  %p1056_p9 = scmp.lt.s32.totalorder %s1054_s3, %s1047_s29 }
  0x51   : > { %p1051_p3 = pneg %p1050_p5  ;;  %p1057_p10 = por %p1056_p9, %p1055_p7 }
  0x53   : > { %p1058_p8 = pnand %p1057_p10, %p1051_p3 }
  0x55   : > { %1061 = shalt.err (!%p1058_p8)
}
  0x56   : > { %886 = dma.hbm_to_vmem [thread:$0]  (!%p1290_p11), %s1288_s23, 128, %s281_s10, %s270_s13  }
  0x57   : > { %p1434_p13 = scmp.ne.s32.totalorder %s1427_s9, 0 }
  0x58   : > { %s1311_s15 = sand.u32 (!%p1434_p13), 1, %s1126_s25   ;;  %p1435_p10 = scmp.ne.s32.totalorder (!%p1434_p13), %s1425_s30, 0 }
  0x59   : > { %289 = sbr.rel (%p1434_p13) target bundleno = 718 (0x2ce), region = 48  ;;  %s757_s12 = sshll.u32 (!%p1434_p13), %s1311_s15, 3 }
  0x5a   : > { %s292_s1 = scalar_lea.sflag (!%p1434_p13), [#allocation3], %s1311_s15  ;;  %s295_s3 = scalar_lea.vmem (!%p1434_p13), [#allocation2], %s757_s12 }
  0x5e   : > { %1105 = dma.done.wait (%p1435_p10), %s292_s1, 128  }
  0x5f   : > { %1107 = vsyncadd (%p1435_p10), %s292_s1, 4294967168  ;;  %p1436_p8 = scmp.eq.s32.totalorder %s1206_s28, 0 }
  0x61   : > { %1109 = dma.done.wait (%p1436_p8), [#allocation6], 1280   ;;  %p1437_p11 = pmov %p1436_p8 }
  0x62   : > { %p1438_p1 = pmov %p1436_p8 }
  0x63   : > { %1111 = vsyncadd (%p1437_p11), [#allocation6], 4294966016 }
  0x64   : > { %1113 = dma.done.wait (%p1438_p1), [#allocation9], 1024   ;;  %p1439_p2 = pmov %p1438_p1 }
  0x65   : > { %v1142_v0 = vmov 0.0   ;;  %vm1143_vm0 = vmmov 0   ;;  %v938_v1 = vld [vmem:[#allocation5 + $0x8] sm:$0xff]   ;;  %v939_v2 = vld [vmem:[#allocation5] sm:$0xff]   ;;  %v339_v3 = vld [vmem:[%s295_s3] sm:$0xff]  ;;  %vm364_vm1 = vcmask 261120  }
  0x66   : > { %1115 = vsyncadd (%p1439_p2), [#allocation9], 4294966272  ;;  %809 = vmatprep.subr.bf16.mxu0 %v1142_v0  ;;  %813 = vmatprep.mubr.msk.bf16.mxu0 %vm1143_vm0, %v1142_v0  ;;  %v940_v4 = vld [vmem:[#allocation7 + $0x38] sm:$0xff]   ;;  %v345_v5 = vpack.c.bf16 %v339_v3, %v339_v3  ;;  %v941_v6 = vld [vmem:[#allocation7 + $0x30] sm:$0xff]   ;;  %s785_s22 = sshll.u32 %s1206_s28, 7  ;;  %s337_s18 = scalar_lea.vmem [#allocation10], %s757_s12 }
  0x67   : > { %817 = vmatprep.subr.bf16.mxu1 %v1142_v0  ;;  %833 = vmatprep.mubr.msk.bf16.mxu1 %vm1143_vm0, %v1142_v0  ;;  %v942_v7 = vld [vmem:[#allocation7 + $0x28] sm:$0xff]   ;;  %v943_v8 = vld [vmem:[#allocation7 + $0x20] sm:$0xff]   ;;  %v944_v9 = vld [vmem:[#allocation7 + $0x18] sm:$0xff]   ;;  %s649_s19 = sshll.u32 %s337_s18, 4  ;;  %s1368_s21 = scalar_lea.hbm %s1418_s7, %s785_s22  ;;  %s1370_s19 = int_to_ptr.vmem [resolvable:$true] %s649_s19 }
  0x68   : > { %810 = vmatpush3.bf16.msra.mxu0 %v938_v1  ;;  %818 = vmatpush3.bf16.msra.mxu1 %v940_v4  ;;  %v945_v10 = vld [vmem:[#allocation7 + $0x10] sm:$0xff]   ;;  %v946_v11 = vld [vmem:[#allocation7 + $0x8] sm:$0xff]   ;;  %v947_v12 = vld [vmem:[#allocation7] sm:$0xff]   ;;  %s636_s1 = scalar_lea.sflag [#allocation4], %s1311_s15  ;;  %s1062_s28 = scalar_lea.vmem %s1370_s19, 128 }
  0x69   : > { %811 = vmatprep.subr.bf16.mxu0 %v1142_v0  ;;  %819 = vmatprep.subr.bf16.mxu1 %v1142_v0  ;;  %v948_v13 = vld [vmem:[#allocation8 + $0x38] sm:$0xff]   ;;  %v949_v14 = vld [vmem:[#allocation8 + $0x30] sm:$0xff]   ;;  %v950_v15 = vld [vmem:[#allocation8 + $0x28] sm:$0xff]   ;;  %p1063_p4 = scmp.ne.s32.totalorder %s1370_s19, %s1062_s28  ;;  %p1440_p6 = scmp.ne.s32.totalorder %s1432_s20, 0 }
  0x6a   : > { %v951_v16 = vld [vmem:[#allocation8 + $0x20] sm:$0xff]   ;;  %v952_v17 = vld [vmem:[#allocation8 + $0x18] sm:$0xff]   ;;  %v953_v18 = vld [vmem:[#allocation8 + $0x10] sm:$0xff]   ;;  %s1144_s12 = smov [#allocation10]  }
  0x6b   : > { %v762_v19 = vld [vmem:[%s1413_s2] ss:$0 sm:$0xff]  ;;  %v954_v27 = vld [vmem:[#allocation8 + $0x8] sm:$0xff]   ;;  %p1064_p12 = pnand %p1063_p4, %p1440_p6  ;;  %s1066_s3 = sshll.u32 %s1144_s12, 4  ;;  %s1067_s3 = int_to_ptr.vmem [resolvable:$false] %s1066_s3 }
  0x6c   : > { %812 = vmatpush3.bf16.msra.mxu0 %v939_v2  ;;  %820 = vmatpush3.bf16.msra.mxu1 %v941_v6  ;;  %v955_v28 = vld [vmem:[#allocation8] sm:$0xff]   ;;  %s1068_s30 = scalar_lea.vmem %s1067_s3, 256  ;;  %p1069_p5 = scmp.lt.s32.totalorder %s1370_s19, %s1067_s3 }
  0x6d   : > { %837 = vmatprep.subr.bf16.mxu0 %v1142_v0  ;;  %821 = vmatprep.subr.bf16.mxu1 %v1142_v0  ;;  %v766_v29 = vld [vmem:[%s1415_s4] ss:$0 sm:$0xff]  ;;  %p1065_p0 = pneg %p1064_p12  ;;  %p1070_p3 = scmp.lt.s32.totalorder %s1068_s30, %s1062_s28 }
  0x6e   : > { %v775_v37 = vld [vmem:[%s1417_s6] ss:$0 sm:$0xff] }
  0x6f   : > { %814 = vmatmul.mubr.msk.bf16.vlgmr.msra.gmra.mxu0 %vm364_vm1, %v345_v5  ;;  %p1071_p7 = por %p1070_p3, %p1069_p5 }
  0x70   : > { %853 = vmatprep.mubr.msk.bf16.mxu0 %vm1143_vm0, %v1142_v0  ;;  %822 = vmatpush3.bf16.msra.mxu1 %v942_v7 }
  0x71   : > { %823 = vmatprep.subr.bf16.mxu1 %v1142_v0  ;;  %838 = vmatpush3.bf16.msra.mxu0 %v948_v13  ;;  %p1072_p9 = pnand %p1071_p7, %p1065_p0 }
  0x72   : > { %839 = vmatprep.subr.bf16.mxu0 %v1142_v0 }
  0x74   : > { %824 = vmatpush3.bf16.msra.mxu1 %v943_v8 }
  0x75   : > { %825 = vmatprep.subr.bf16.mxu1 %v1142_v0  ;;  %840 = vmatpush3.bf16.msra.mxu0 %v949_v14 }
  0x76   : > { %841 = vmatprep.subr.bf16.mxu0 %v1142_v0 }
  0x78   : > { %826 = vmatpush3.bf16.msra.mxu1 %v944_v9 }
  0x79   : > { %827 = vmatprep.subr.bf16.mxu1 %v1142_v0  ;;  %842 = vmatpush3.bf16.msra.mxu0 %v950_v15 }
  0x7a   : > { %843 = vmatprep.subr.bf16.mxu0 %v1142_v0 }
  0x7c   : > { %828 = vmatpush3.bf16.msra.mxu1 %v945_v10 }
  0x7d   : > { %829 = vmatprep.subr.bf16.mxu1 %v1142_v0  ;;  %844 = vmatpush3.bf16.msra.mxu0 %v951_v16 }
  0x7e   : > { %845 = vmatprep.subr.bf16.mxu0 %v1142_v0 }
  0x80   : > { %830 = vmatpush3.bf16.msra.mxu1 %v946_v11 }
  0x81   : > { %831 = vmatprep.subr.bf16.mxu1 %v1142_v0  ;;  %846 = vmatpush3.bf16.msra.mxu0 %v952_v17 }
  0x82   : > { %847 = vmatprep.subr.bf16.mxu0 %v1142_v0 }
  0x84   : > { %832 = vmatpush3.bf16.msra.mxu1 %v947_v12 }
  0x85   : > { %848 = vmatpush3.bf16.msra.mxu0 %v953_v18 }
  0x86   : > { %849 = vmatprep.subr.bf16.mxu0 %v1142_v0 }
  0x89   : > { %850 = vmatpush3.bf16.msra.mxu0 %v954_v27 }
  0x8a   : > { %851 = vmatprep.subr.bf16.mxu0 %v1142_v0 }
  0x8d   : > { %852 = vmatpush3.bf16.msra.mxu0 %v955_v28 }
 0x12f   : > { %v402_v20 = vpop.f32.mrf.mxu0 }
 0x130   : > { %v403_v21 = vadd.f32 %v762_v19, %v402_v20 }
 0x131   : > { %v815_v22 = vpop.f32.mrf.mxu0 }
 0x132   : > { %v408_v23 = vmax.f32 %v403_v21, 0.0 }
 0x133   : > { %v405_v24 = vpop.f32.mrf.mxu0 }
 0x134   : > { %v426_v25 = vpack.c.bf16 %v408_v23, %v408_v23 }
 0x135   : > { %v816_v26 = vpop.f32.mrf.mxu0 }
 0x136   : > { %834 = vmatmul.mubr.bf16.vlgmr.msra.gmra.mxu1 %v426_v25 }
 0x1f6   : > { %v515_v30 = vpop.f32.mrf.mxu1 }
 0x1f7   : > { %v516_v31 = vadd.f32 %v766_v29, %v515_v30 }
 0x1f8   : > { %v835_v32 = vpop.f32.mrf.mxu1 }
 0x1f9   : > { %v521_v33 = vmax.f32 %v516_v31, 0.0 }
 0x1fa   : > { %v518_v34 = vpop.f32.mrf.mxu1 }
 0x1fb   : > { %v539_v35 = vpack.c.bf16 %v521_v33, %v521_v33 }
 0x1fc   : > { %v836_v36 = vpop.f32.mrf.mxu1 }
 0x1fd   : > { %854 = vmatmul.mubr.bf16.vlgmr.msra.gmra.mxu0 %v539_v35 }
 0x2bd   : > { %v628_v38 = vpop.f32.mrf.mxu0 }
 0x2be   : > { %v629_v39 = vadd.f32 %v775_v37, %v628_v38 }
 0x2bf   : > { %v855_v40 = vpop.f32.mrf.mxu0 }
 0x2c0   : > { %634 = vst [vmem:[%s337_s18] sm:$0xff] %v629_v39 }
 0x2c1   : > { %v631_v41 = vpop.f32.mrf.mxu0 }
 0x2c2   : > { %1075 = shalt.err (!%p1072_p9)
}
 0x2c3   : > { %s1076_s9 = scalar_lea.hbm %s1368_s21, 128  ;;  %s1080_s10 = scalar_lea.hbm %s1418_s7, 256 }
 0x2c4   : > { %p1077_p13 = scmp.ne.s32.totalorder %s1368_s21, %s1076_s9  ;;  %p1081_p11 = scmp.lt.s32.totalorder %s1368_s21, %s1418_s7 }
 0x2c5   : > { %p1082_p1 = scmp.lt.s32.totalorder %s1080_s10, %s1076_s9 }
 0x2c6   : > { %p1078_p10 = pnand %p1077_p13, %p1440_p6 }
 0x2c7   : > { %p1083_p2 = por %p1082_p1, %p1081_p11 }
 0x2c8   : > { %p1079_p8 = pneg %p1078_p10 }
 0x2ca   : > { %p1084_p4 = pnand %p1083_p2, %p1079_p8 }
 0x2cc   : > { %1087 = shalt.err (!%p1084_p4)
}
 0x2cd   : > { %871 = dma.vmem_to_hbm [thread:$0]  (%p1440_p6), %s1370_s19, 128, %s1368_s21, %s636_s1   ;;  %v856_v42 = vpop.f32.mrf.mxu0 }
 0x2ce PF: > { %s661_s22 = sand.u32 1, %s1122_s24   ;;  %p1441_p12 = scmp.ne.s32.totalorder %s1426_s8, 0 }
 0x2cf   : > { %p1442_p0 = scmp.ge.s32.totalorder %s1134_s27, 2  ;;  %s662_s18 = scalar_lea.sflag [#allocation4], %s661_s22 }
 0x2d1   : > { %p888_p5 = pnand %p1442_p0, %p1441_p12 }
 0x2d3   : > { %p889_p3 = pneg %p888_p5 }
 0x2d5   : > { %1117 = dma.done.wait (%p889_p3), %s662_s18, 128  }
 0x2d6   : > { %1119 = vsyncadd (%p889_p3), %s662_s18, 4294967168  ;;  %p22_p7 = scmp.ge.s32.totalorder %s1265_s14, 4   ;;  %s1443_s24 = smov %s1126_s25 }
 0x2d7   : > { %s1444_s25 = smov %s1130_s26  ;;  %s1445_s26 = smov %s1275_s17 }
 0x2d8   : > { %s1446_s27 = smov %s1265_s14  ;;  %24 = sbr.rel (!%p22_p7) target bundleno = 10 (0xa), region = 105 }
 0x2dd   :  { %667 = vsyncpa [#allocation3], 1 }
 0x2de   :  { %669 = vsyncpa [#allocation3 + $0x1], 1 }
 0x2df   :  { %670 = vsyncpa [#allocation6], 1 }
 0x2e0   :  { %671 = vsyncpa [#allocation9], 1 }
 0x2e1   :  { %672 = vsyncpa [#allocation4], 1 }
 0x2e2   :  { %674 = vsyncpa [#allocation4 + $0x1], 1 }

// kernel: tpu_custom_call.1
= control target key start
LH: loop header
LB: loop body
LE: loop exit
PB: predicated region body
PF: predicated region fallthrough
CT: control target
= control target key end

     0   :  { %s1411_s0 = inlined_call_operand.hbm [shape: f32[16,32], index: 0, kind: input, shape index: {}]   ;;  %s1412_s1 = inlined_call_operand.hbm [shape: bf16[32,128], index: 1, kind: input, shape index: {}]   ;;  %s1413_s2 = inlined_call_operand.vmem [shape: f32[1,128], index: 2, kind: input, shape index: {}]   ;;  %s1414_s3 = inlined_call_operand.hbm [shape: bf16[128,128], index: 3, kind: input, shape index: {}]   ;;  %s1415_s4 = inlined_call_operand.vmem [shape: f32[1,128], index: 4, kind: input, shape index: {}]   ;;  %s1416_s5 = inlined_call_operand.hbm [shape: bf16[128,128], index: 5, kind: input, shape index: {}]   ;;  %s1417_s6 = inlined_call_operand.vmem [shape: f32[1,128], index: 6, kind: input, shape index: {}]   ;;  %s1418_s7 = inlined_call_operand.hbm [shape: f32[16,128], index: 7, kind: output, shape index: {}]  }
   0x1   :  { %1423 = sst [smem:[#allocation15_spill]] %s1412_s1 }
   0x2   :  { %1424 = sst [smem:[#allocation16_spill]] %s1414_s3 }
   0x3   :  { %12 = vsyncpa [#allocation3], 0 }
   0x4   :  { %14 = vsyncpa [#allocation3 + $0x1], 0 }
   0x5   :  { %15 = vsyncpa [#allocation6], 0 }
   0x6   :  { %16 = vsyncpa [#allocation9], 0 }
   0x7   :  { %17 = vsyncpa [#allocation4], 0 }
   0x8   :  { %19 = vsyncpa [#allocation4 + $0x1], 0  ;;  %s1185_s24 = smov 0   ;;  %s1187_s25 = smov 0  }
   0x9   :  { %s1189_s26 = smov 0   ;;  %s1191_s27 = smov 0  }
   0xa LB: > { %s1206_s28 = sadd.s32 4294967295, %s1134_s27   ;;  %s748_s29 = sadd.s32 4294967294, %s1134_s27   ;;  %s1134_s27 = sphi %s1191_s27, %s1446_s27   ;;  %s1130_s26 = sphi %s1189_s26, %s1445_s26   ;;  %s1126_s25 = sphi %s1187_s25, %s1444_s25   ;;  %s1122_s24 = sphi %s1185_s24, %s1443_s24  }
   0xb   : > { %p45_p0 = scmp.ne.s32.totalorder %s1126_s25, %s1122_s24  ;;  %p1419_p1 = scmp.eq.s32.totalorder %s1206_s28, 0 }
   0xc   : > { %p201_p3 = scmp.eq.s32.totalorder %s748_s29, 1  ;;  %p749_p5 = scmp.ge.s32.totalorder %s1134_s27, 1 }
   0xd   : > { %p1215_p4 = por %p1419_p1, %p45_p0  ;;  %p208_p7 = scmp.lt.s32.totalorder %s1134_s27, 3 }
   0xe   : > { %p1220_p6 = por %p201_p3, %p45_p0  ;;  %s1136_s10 = smov [#allocation5]  }
   0xf   : > { %s1425_s30 = scalar_select %p1215_p4, 1, 0 }
  0x10   : > { %s1426_s8 = scalar_select %p1220_p6, 1, 0 }
  0x11   : > { %p1225_p8 = pnand %p749_p5, %p208_p7  ;;  %s220_s11 = sshll.u32 %s1136_s10, 4  ;;  %s221_s11 = int_to_ptr.vmem [resolvable:$true] %s220_s11 }
  0x12   : > { %s1137_s13 = smov [#allocation7]   ;;  %s1138_s15 = smov [#allocation8]  }
  0x13   : > { %s1427_s9 = scalar_select %p1225_p8, 1, 0 }
  0x14   : > { %p873_p9 = pneg %p1225_p8  ;;  %s236_s14 = sshll.u32 %s1137_s13, 4  ;;  %s237_s14 = int_to_ptr.vmem [resolvable:$true] %s236_s14 }
  0x15   : > { %s252_s16 = sshll.u32 %s1138_s15, 4  ;;  %s967_s17 = scalar_lea.vmem %s221_s11, 256  ;;  %s253_s16 = int_to_ptr.vmem [resolvable:$true] %s252_s16 }
  0x16   : > { %p1234_p11 = pnand %p873_p9, %p1419_p1  ;;  %p968_p13 = scmp.ne.s32.totalorder %s221_s11, %s967_s17 }
  0x17   : > { %p975_p5 = scmp.lt.s32.totalorder %s221_s11, %s221_s11  ;;  %p976_p7 = scmp.lt.s32.totalorder %s967_s17, %s967_s17 }
  0x18   : > { %p958_p12 = pneg %p1234_p11 }
  0x19   : > { %p977_p9 = por %p976_p7, %p975_p5 }
  0x1a   : > { %p970_p0 = pnand %p968_p13, %p958_p12 }
  0x1c   : > { %p971_p3 = pneg %p970_p0 }
  0x1e   : > { %p978_p10 = pnand %p977_p9, %p971_p3 }
  0x20   : > { %981 = shalt.err (!%p978_p10)
}
  0x21   : > { %s1139_s18 = smov 64   ;;  %s1140_s19 = smov 4  }
  0x22   : > { %s1429_s1 = sld [smem:[#allocation15_spill]]  ;;  %s993_s22 = scalar_lea.vmem %s237_s14, 1024 }
  0x23   : > { %p994_p1 = scmp.ne.s32.totalorder %s237_s14, %s993_s22  ;;  %p1001_p2 = scmp.lt.s32.totalorder %s237_s14, %s237_s14 }
  0x24   : > { %p1002_p6 = scmp.lt.s32.totalorder %s993_s22, %s993_s22 }
  0x25   : > { %p996_p13 = pnand %p994_p1, %p958_p12 }
  0x26   : > { %p1003_p5 = por %p1002_p6, %p1001_p2 }
  0x27   : > { %p997_p0 = pneg %p996_p13 }
  0x28   : > { %876 = dma.hbm_to_vmem [thread:$0]  (!%p1234_p11), %s1429_s1, 256, %s221_s11, [#allocation6], %s1139_s18, %s1139_s18, %s1140_s19  }
  0x29   : > { %p1004_p3 = pnand %p1003_p5, %p997_p0 }
  0x2b   : > { %1007 = shalt.err (!%p1004_p3)
}
  0x2c   : > { %s1430_s3 = sld [smem:[#allocation16_spill]]  ;;  %s1019_s10 = scalar_lea.vmem %s253_s16, 1024 }
  0x2d   : > { %p1020_p10 = scmp.ne.s32.totalorder %s253_s16, %s1019_s10  ;;  %p1027_p9 = scmp.lt.s32.totalorder %s253_s16, %s253_s16 }
  0x2e   : > { %p1028_p13 = scmp.lt.s32.totalorder %s1019_s10, %s1019_s10 }
  0x2f   : > { %p1022_p7 = pnand %p1020_p10, %p958_p12 }
  0x30   : > { %p1029_p4 = por %p1028_p13, %p1027_p9 }
  0x31   : > { %p1023_p1 = pneg %p1022_p7 }
  0x32   : > { %879 = dma.hbm_to_vmem [thread:$0]  (!%p1234_p11), %s1430_s3, 1024, %s237_s14, [#allocation6], %s1139_s18, %s1139_s18, %s1140_s19  }
  0x33   : > { %p1030_p2 = pnand %p1029_p4, %p1023_p1 }
  0x35   : > { %1033 = shalt.err (!%p1030_p2)
}
  0x36   : > { %882 = dma.hbm_to_vmem [thread:$0]  (!%p1234_p11), %s1416_s5, 1024, %s253_s16, [#allocation9], %s1139_s18, %s1139_s18, %s1140_s19  }
  0x37   : > { %s1265_s14 = sadd.s32 1, %s1134_s27   ;;  %s32_s12 = sadd.s32 1, %s1130_s26 }
  0x38   : > { %s29_s15 = ssub.s32 %s1134_s27, %s1265_s14  ;;  %p39_p6 = scmp.ne.s32.totalorder %s1130_s26, %s1126_s25 }
  0x39   : > { %p30_p4 = scmp.eq.s32.totalorder %s29_s15, 0  ;;  %p40_p12 = scmp.eq.s32.totalorder %s1134_s27, 0 }
  0x3a   : > { %p894_p0 = scmp.lt.s32.totalorder %s1134_s27, 2  ;;  %p1431_p3 = scmp.eq.s32.totalorder %s1206_s28, 1 }
  0x3b   : > { %s1275_s17 = scalar_select %p30_p4, %s1130_s26, %s32_s12  }
  0x3c   : > { %p41_p5 = por %p40_p12, %p39_p6  ;;  %p1279_p10 = por %p1431_p3, %p39_p6 }
  0x3d   : > { %s269_s21 = sand.u32 1, %s1130_s26   ;;  %s755_s22 = sshll.u32 %s1134_s27, 7 }
  0x3e   : > { %s1432_s20 = scalar_select %p1279_p10, 1, 0 }
  0x3f   : > { %s754_s16 = sshll.u32 %s269_s21, 3  ;;  %s1288_s23 = scalar_lea.hbm %s1411_s0, %s755_s22 }
  0x40   : > { %s273_s29 = scalar_lea.vmem [#allocation2], %s754_s16  ;;  %p1290_p11 = pnand %p894_p0, %p41_p5 }
  0x41   : > { %s280_s10 = sshll.u32 %s273_s29, 4  ;;  %s270_s13 = scalar_lea.sflag [#allocation3], %s269_s21  ;;  %s281_s10 = int_to_ptr.vmem [resolvable:$true] %s280_s10 }
  0x42   : > { %s1034_s15 = scalar_lea.hbm %s1288_s23, 128  ;;  %p1036_p1 = pneg %p1290_p11 }
  0x43   : > { %p1035_p7 = scmp.ne.s32.totalorder %s1288_s23, %s1034_s15  ;;  %s1039_s18 = scalar_lea.hbm %s1411_s0, 256 }
  0x44   : > { %p1040_p2 = scmp.lt.s32.totalorder %s1288_s23, %s1411_s0  ;;  %p1041_p4 = scmp.lt.s32.totalorder %s1039_s18, %s1034_s15 }
  0x45   : > { %p1037_p9 = pnand %p1036_p1, %p1035_p7 }
  0x46   : > { %p1042_p6 = por %p1041_p4, %p1040_p2 }
  0x47   : > { %p1038_p13 = pneg %p1037_p9 }
  0x49   : > { %p1043_p12 = pnand %p1042_p6, %p1038_p13 }
  0x4b   : > { %1046 = shalt.err (!%p1043_p12)
}
  0x4c   : > { %s1047_s29 = scalar_lea.vmem %s281_s10, 128  ;;  %s1141_s21 = smov [#allocation2]  }
  0x4d   : > { %p1048_p0 = scmp.ne.s32.totalorder %s281_s10, %s1047_s29  ;;  %s1052_s1 = sshll.u32 %s1141_s21, 4  ;;  %s1053_s1 = int_to_ptr.vmem [resolvable:$false] %s1052_s1 }
  0x4e   : > { %s1054_s3 = scalar_lea.vmem %s1053_s1, 256  ;;  %p1055_p7 = scmp.lt.s32.totalorder %s281_s10, %s1053_s1 }
  0x4f   : > { %p1050_p5 = pnand %p1048_p0, %p1036_p1  ;;  %p1056_p9 = scmp.lt.s32.totalorder %s1054_s3, %s1047_s29 }
  0x51   : > { %p1051_p3 = pneg %p1050_p5  ;;  %p1057_p10 = por %p1056_p9, %p1055_p7 }
  0x53   : > { %p1058_p8 = pnand %p1057_p10, %p1051_p3 }
  0x55   : > { %1061 = shalt.err (!%p1058_p8)
}
  0x56   : > { %886 = dma.hbm_to_vmem [thread:$0]  (!%p1290_p11), %s1288_s23, 128, %s281_s10, %s270_s13  }
  0x57   : > { %p1434_p13 = scmp.ne.s32.totalorder %s1427_s9, 0 }
  0x58   : > { %s1311_s15 = sand.u32 (!%p1434_p13), 1, %s1126_s25   ;;  %p1435_p10 = scmp.ne.s32.totalorder (!%p1434_p13), %s1425_s30, 0 }
  0x59   : > { %289 = sbr.rel (%p1434_p13) target bundleno = 718 (0x2ce), region = 48  ;;  %s757_s12 = sshll.u32 (!%p1434_p13), %s1311_s15, 3 }
  0x5a   : > { %s292_s1 = scalar_lea.sflag (!%p1434_p13), [#allocation3], %s1311_s15  ;;  %s295_s3 = scalar_lea.vmem (!%p1434_p13), [#allocation2], %s757_s12 }
  0x5e   : > { %1105 = dma.done.wait (%p1435_p10), %s292_s1, 128  }
  0x5f   : > { %1107 = vsyncadd (%p1435_p10), %s292_s1, 4294967168  ;;  %p1436_p8 = scmp.eq.s32.totalorder %s1206_s28, 0 }
  0x61   : > { %1109 = dma.done.wait (%p1436_p8), [#allocation6], 1280   ;;  %p1437_p11 = pmov %p1436_p8 }
  0x62   : > { %p1438_p1 = pmov %p1436_p8 }
  0x63   : > { %1111 = vsyncadd (%p1437_p11), [#allocation6], 4294966016 }
  0x64   : > { %1113 = dma.done.wait (%p1438_p1), [#allocation9], 1024   ;;  %p1439_p2 = pmov %p1438_p1 }
  0x65   : > { %v1142_v0 = vmov 0.0   ;;  %vm1143_vm0 = vmmov 0   ;;  %v938_v1 = vld [vmem:[#allocation5 + $0x8] sm:$0xff]   ;;  %v939_v2 = vld [vmem:[#allocation5] sm:$0xff]   ;;  %v339_v3 = vld [vmem:[%s295_s3] sm:$0xff]  ;;  %vm364_vm1 = vcmask 261120  }
  0x66   : > { %1115 = vsyncadd (%p1439_p2), [#allocation9], 4294966272  ;;  %809 = vmatprep.subr.bf16.mxu0 %v1142_v0  ;;  %813 = vmatprep.mubr.msk.bf16.mxu0 %vm1143_vm0, %v1142_v0  ;;  %v940_v4 = vld [vmem:[#allocation7 + $0x38] sm:$0xff]   ;;  %v345_v5 = vpack.c.bf16 %v339_v3, %v339_v3  ;;  %v941_v6 = vld [vmem:[#allocation7 + $0x30] sm:$0xff]   ;;  %s785_s22 = sshll.u32 %s1206_s28, 7  ;;  %s337_s18 = scalar_lea.vmem [#allocation10], %s757_s12 }
  0x67   : > { %817 = vmatprep.subr.bf16.mxu1 %v1142_v0  ;;  %833 = vmatprep.mubr.msk.bf16.mxu1 %vm1143_vm0, %v1142_v0  ;;  %v942_v7 = vld [vmem:[#allocation7 + $0x28] sm:$0xff]   ;;  %v943_v8 = vld [vmem:[#allocation7 + $0x20] sm:$0xff]   ;;  %v944_v9 = vld [vmem:[#allocation7 + $0x18] sm:$0xff]   ;;  %s649_s19 = sshll.u32 %s337_s18, 4  ;;  %s1368_s21 = scalar_lea.hbm %s1418_s7, %s785_s22  ;;  %s1370_s19 = int_to_ptr.vmem [resolvable:$true] %s649_s19 }
  0x68   : > { %810 = vmatpush3.bf16.msra.mxu0 %v938_v1  ;;  %818 = vmatpush3.bf16.msra.mxu1 %v940_v4  ;;  %v945_v10 = vld [vmem:[#allocation7 + $0x10] sm:$0xff]   ;;  %v946_v11 = vld [vmem:[#allocation7 + $0x8] sm:$0xff]   ;;  %v947_v12 = vld [vmem:[#allocation7] sm:$0xff]   ;;  %s636_s1 = scalar_lea.sflag [#allocation4], %s1311_s15  ;;  %s1062_s28 = scalar_lea.vmem %s1370_s19, 128 }
  0x69   : > { %811 = vmatprep.subr.bf16.mxu0 %v1142_v0  ;;  %819 = vmatprep.subr.bf16.mxu1 %v1142_v0  ;;  %v948_v13 = vld [vmem:[#allocation8 + $0x38] sm:$0xff]   ;;  %v949_v14 = vld [vmem:[#allocation8 + $0x30] sm:$0xff]   ;;  %v950_v15 = vld [vmem:[#allocation8 + $0x28] sm:$0xff]   ;;  %p1063_p4 = scmp.ne.s32.totalorder %s1370_s19, %s1062_s28  ;;  %p1440_p6 = scmp.ne.s32.totalorder %s1432_s20, 0 }
  0x6a   : > { %v951_v16 = vld [vmem:[#allocation8 + $0x20] sm:$0xff]   ;;  %v952_v17 = vld [vmem:[#allocation8 + $0x18] sm:$0xff]   ;;  %v953_v18 = vld [vmem:[#allocation8 + $0x10] sm:$0xff]   ;;  %s1144_s12 = smov [#allocation10]  }
  0x6b   : > { %v762_v19 = vld [vmem:[%s1413_s2] ss:$0 sm:$0xff]  ;;  %v954_v27 = vld [vmem:[#allocation8 + $0x8] sm:$0xff]   ;;  %p1064_p12 = pnand %p1063_p4, %p1440_p6  ;;  %s1066_s3 = sshll.u32 %s1144_s12, 4  ;;  %s1067_s3 = int_to_ptr.vmem [resolvable:$false] %s1066_s3 }
  0x6c   : > { %812 = vmatpush3.bf16.msra.mxu0 %v939_v2  ;;  %820 = vmatpush3.bf16.msra.mxu1 %v941_v6  ;;  %v955_v28 = vld [vmem:[#allocation8] sm:$0xff]   ;;  %s1068_s30 = scalar_lea.vmem %s1067_s3, 256  ;;  %p1069_p5 = scmp.lt.s32.totalorder %s1370_s19, %s1067_s3 }
  0x6d   : > { %837 = vmatprep.subr.bf16.mxu0 %v1142_v0  ;;  %821 = vmatprep.subr.bf16.mxu1 %v1142_v0  ;;  %v766_v29 = vld [vmem:[%s1415_s4] ss:$0 sm:$0xff]  ;;  %p1065_p0 = pneg %p1064_p12  ;;  %p1070_p3 = scmp.lt.s32.totalorder %s1068_s30, %s1062_s28 }
  0x6e   : > { %v775_v37 = vld [vmem:[%s1417_s6] ss:$0 sm:$0xff] }
  0x6f   : > { %814 = vmatmul.mubr.msk.bf16.vlgmr.msra.gmra.mxu0 %vm364_vm1, %v345_v5  ;;  %p1071_p7 = por %p1070_p3, %p1069_p5 }
  0x70   : > { %853 = vmatprep.mubr.msk.bf16.mxu0 %vm1143_vm0, %v1142_v0  ;;  %822 = vmatpush3.bf16.msra.mxu1 %v942_v7 }
  0x71   : > { %823 = vmatprep.subr.bf16.mxu1 %v1142_v0  ;;  %838 = vmatpush3.bf16.msra.mxu0 %v948_v13  ;;  %p1072_p9 = pnand %p1071_p7, %p1065_p0 }
  0x72   : > { %839 = vmatprep.subr.bf16.mxu0 %v1142_v0 }
  0x74   : > { %824 = vmatpush3.bf16.msra.mxu1 %v943_v8 }
  0x75   : > { %825 = vmatprep.subr.bf16.mxu1 %v1142_v0  ;;  %840 = vmatpush3.bf16.msra.mxu0 %v949_v14 }
  0x76   : > { %841 = vmatprep.subr.bf16.mxu0 %v1142_v0 }
  0x78   : > { %826 = vmatpush3.bf16.msra.mxu1 %v944_v9 }
  0x79   : > { %827 = vmatprep.subr.bf16.mxu1 %v1142_v0  ;;  %842 = vmatpush3.bf16.msra.mxu0 %v950_v15 }
  0x7a   : > { %843 = vmatprep.subr.bf16.mxu0 %v1142_v0 }
  0x7c   : > { %828 = vmatpush3.bf16.msra.mxu1 %v945_v10 }
  0x7d   : > { %829 = vmatprep.subr.bf16.mxu1 %v1142_v0  ;;  %844 = vmatpush3.bf16.msra.mxu0 %v951_v16 }
  0x7e   : > { %845 = vmatprep.subr.bf16.mxu0 %v1142_v0 }
  0x80   : > { %830 = vmatpush3.bf16.msra.mxu1 %v946_v11 }
  0x81   : > { %831 = vmatprep.subr.bf16.mxu1 %v1142_v0  ;;  %846 = vmatpush3.bf16.msra.mxu0 %v952_v17 }
  0x82   : > { %847 = vmatprep.subr.bf16.mxu0 %v1142_v0 }
  0x84   : > { %832 = vmatpush3.bf16.msra.mxu1 %v947_v12 }
  0x85   : > { %848 = vmatpush3.bf16.msra.mxu0 %v953_v18 }
  0x86   : > { %849 = vmatprep.subr.bf16.mxu0 %v1142_v0 }
  0x89   : > { %850 = vmatpush3.bf16.msra.mxu0 %v954_v27 }
  0x8a   : > { %851 = vmatprep.subr.bf16.mxu0 %v1142_v0 }
  0x8d   : > { %852 = vmatpush3.bf16.msra.mxu0 %v955_v28 }
 0x12f   : > { %v402_v20 = vpop.f32.mrf.mxu0 }
 0x130   : > { %v403_v21 = vadd.f32 %v762_v19, %v402_v20 }
 0x131   : > { %v815_v22 = vpop.f32.mrf.mxu0 }
 0x132   : > { %v408_v23 = vmax.f32 %v403_v21, 0.0 }
 0x133   : > { %v405_v24 = vpop.f32.mrf.mxu0 }
 0x134   : > { %v426_v25 = vpack.c.bf16 %v408_v23, %v408_v23 }
 0x135   : > { %v816_v26 = vpop.f32.mrf.mxu0 }
 0x136   : > { %834 = vmatmul.mubr.bf16.vlgmr.msra.gmra.mxu1 %v426_v25 }
 0x1f6   : > { %v515_v30 = vpop.f32.mrf.mxu1 }
 0x1f7   : > { %v516_v31 = vadd.f32 %v766_v29, %v515_v30 }
 0x1f8   : > { %v835_v32 = vpop.f32.mrf.mxu1 }
 0x1f9   : > { %v521_v33 = vmax.f32 %v516_v31, 0.0 }
 0x1fa   : > { %v518_v34 = vpop.f32.mrf.mxu1 }
 0x1fb   : > { %v539_v35 = vpack.c.bf16 %v521_v33, %v521_v33 }
 0x1fc   : > { %v836_v36 = vpop.f32.mrf.mxu1 }
 0x1fd   : > { %854 = vmatmul.mubr.bf16.vlgmr.msra.gmra.mxu0 %v539_v35 }
 0x2bd   : > { %v628_v38 = vpop.f32.mrf.mxu0 }
 0x2be   : > { %v629_v39 = vadd.f32 %v775_v37, %v628_v38 }
 0x2bf   : > { %v855_v40 = vpop.f32.mrf.mxu0 }
 0x2c0   : > { %634 = vst [vmem:[%s337_s18] sm:$0xff] %v629_v39 }
 0x2c1   : > { %v631_v41 = vpop.f32.mrf.mxu0 }
 0x2c2   : > { %1075 = shalt.err (!%p1072_p9)
}
 0x2c3   : > { %s1076_s9 = scalar_lea.hbm %s1368_s21, 128  ;;  %s1080_s10 = scalar_lea.hbm %s1418_s7, 256 }
 0x2c4   : > { %p1077_p13 = scmp.ne.s32.totalorder %s1368_s21, %s1076_s9  ;;  %p1081_p11 = scmp.lt.s32.totalorder %s1368_s21, %s1418_s7 }
 0x2c5   : > { %p1082_p1 = scmp.lt.s32.totalorder %s1080_s10, %s1076_s9 }
 0x2c6   : > { %p1078_p10 = pnand %p1077_p13, %p1440_p6 }
 0x2c7   : > { %p1083_p2 = por %p1082_p1, %p1081_p11 }
 0x2c8   : > { %p1079_p8 = pneg %p1078_p10 }
 0x2ca   : > { %p1084_p4 = pnand %p1083_p2, %p1079_p8 }
 0x2cc   : > { %1087 = shalt.err (!%p1084_p4)
}
 0x2cd   : > { %871 = dma.vmem_to_hbm [thread:$0]  (%p1440_p6), %s1370_s19, 128, %s1368_s21, %s636_s1   ;;  %v856_v42 = vpop.f32.mrf.mxu0 }
 0x2ce PF: > { %s661_s22 = sand.u32 1, %s1122_s24   ;;  %p1441_p12 = scmp.ne.s32.totalorder %s1426_s8, 0 }
 0x2cf   : > { %p1442_p0 = scmp.ge.s32.totalorder %s1134_s27, 2  ;;  %s662_s18 = scalar_lea.sflag [#allocation4], %s661_s22 }
 0x2d1   : > { %p888_p5 = pnand %p1442_p0, %p1441_p12 }
 0x2d3   : > { %p889_p3 = pneg %p888_p5 }
 0x2d5   : > { %1117 = dma.done.wait (%p889_p3), %s662_s18, 128  }
 0x2d6   : > { %1119 = vsyncadd (%p889_p3), %s662_s18, 4294967168  ;;  %p22_p7 = scmp.ge.s32.totalorder %s1265_s14, 4   ;;  %s1443_s24 = smov %s1126_s25 }
 0x2d7   : > { %s1444_s25 = smov %s1130_s26  ;;  %s1445_s26 = smov %s1275_s17 }
 0x2d8   : > { %s1446_s27 = smov %s1265_s14  ;;  %24 = sbr.rel (!%p22_p7) target bundleno = 10 (0xa), region = 105 }
 0x2dd   :  { %667 = vsyncpa [#allocation3], 1 }
 0x2de   :  { %669 = vsyncpa [#allocation3 + $0x1], 1 }
 0x2df   :  { %670 = vsyncpa [#allocation6], 1 }
 0x2e0   :  { %671 = vsyncpa [#allocation9], 1 }
 0x2e1   :  { %672 = vsyncpa [#allocation4], 1 }
 0x2e2   :  { %674 = vsyncpa [#allocation4 + $0x1], 1 }

</bundles_post_ra>
